<compile_context>
chip_gen: v6e
topology: v6e:2x2x1
jax: 0.10.0
libtpu: 0.0.40
codegen_flags: <defaults>
</compile_context>

<pallas_src>
import jax
import jax.numpy as jnp
from jax.experimental import pallas as pl
from jax.experimental.pallas import tpu as pltpu

_LANE = 128     # lane width (last dim)
_SUBLANE = 8    # f32 sublane width (second-to-last dim)


def _round_up(x, m):
    return (x + m - 1) // m * m


# ---------------------------------------------------------------------------
# Small-shape path: one VMEM-resident block, no grid, no pipeline machinery.
# ---------------------------------------------------------------------------
def _ts_small_kernel(x_ref, w_ref, b_ref, out_ref):
    # logits = x @ W' + b'  (temperature already folded into W', b')
    out_ref[...] = (
        jnp.dot(x_ref[...], w_ref[...], preferred_element_type=jnp.float32)
        + b_ref[...]
    ).astype(out_ref.dtype)


# ---------------------------------------------------------------------------
# Large-shape path: batch-parallel + K-reduction grid with f32 accumulator.
# (Not triggered at the test size; kept for realistic batch/hidden.)
# ---------------------------------------------------------------------------
def _ts_tiled_kernel(x_ref, w_ref, b_ref, out_ref, acc_ref):
    @pl.when(pl.program_id(1) == 0)
    def _init():
        acc_ref[...] = jnp.zeros_like(acc_ref)

    acc_ref[...] += jnp.dot(
        x_ref[...], w_ref[...], preferred_element_type=jnp.float32
    )

    @pl.when(pl.program_id(1) == pl.num_programs(1) - 1)
    def _finalize():
        out_ref[...] = (acc_ref[...] + b_ref[...]).astype(out_ref.dtype)


def ts_model_forward(x, w, b, temperature):
    """TSModel.forward: (x @ w + b) / temperature, computed in Pallas.

    x:           (batch, hidden)  f32
    w:           (hidden, n_task) f32
    b:           (n_task,)        f32
    temperature: (n_task,)        f32
    returns:     (batch, n_task)  f32
    """
    batch, hidden = x.shape
    n_task = w.shape[1]

    # Fold temperature scaling into the linear head (wrapper-side; removes the
    # in-kernel divide entirely, same math as (x@w+b)/t up to fp rounding).
    inv_t = 1.0 / temperature.astype(jnp.float32)
    w_s = w.astype(jnp.float32) * inv_t[None, :]
    b_s = b.astype(jnp.float32) * inv_t

    # Lane/sublane-dense padding; padded cols are zeros and sliced off after.
    n_pad = _round_up(n_task, _LANE)
    batch_p = _round_up(batch, _SUBLANE)

    x_p = jnp.pad(x.astype(jnp.float32), ((0, batch_p - batch), (0, 0)))
    w_p = jnp.pad(w_s, ((0, 0), (0, n_pad - n_task)))
    b_p = jnp.pad(b_s, (0, n_pad - n_task)).reshape(1, n_pad)

    flops = 2 * batch_p * hidden * n_pad
    bytes_accessed = 4 * (x_p.size + w_p.size + b_p.size + batch_p * n_pad)
    cost = pl.CostEstimate(
        flops=flops, transcendentals=0, bytes_accessed=bytes_accessed
    )

    small = (batch_p <= 512) and (hidden <= 2048) and (n_pad <= 512)

    if small:
        out_p = pl.pallas_call(
            _ts_small_kernel,
            out_shape=jax.ShapeDtypeStruct((batch_p, n_pad), jnp.float32),
            in_specs=[
                pl.BlockSpec(memory_space=pltpu.MemorySpace.VMEM),
                pl.BlockSpec(memory_space=pltpu.MemorySpace.VMEM),
                pl.BlockSpec(memory_space=pltpu.MemorySpace.VMEM),
            ],
            out_specs=pl.BlockSpec(memory_space=pltpu.MemorySpace.VMEM),
            cost_estimate=cost,
        )(x_p, w_p, b_p)
        return out_p[:batch, :n_task]

    # --- tiled path for realistic batch/hidden ------------------------------
    tm = min(256, batch_p)                 # batch tile (parallel)
    tk = min(512, hidden)                  # reduction tile (arbitrary)
    hidden_p = _round_up(hidden, tk)
    batch_p2 = _round_up(batch_p, tm)
    x_t = jnp.pad(x_p, ((0, batch_p2 - batch_p), (0, hidden_p - hidden)))
    w_t = jnp.pad(w_p, ((0, hidden_p - hidden), (0, 0)))

    out_p = pl.pallas_call(
        _ts_tiled_kernel,
        out_shape=jax.ShapeDtypeStruct((batch_p2, n_pad), jnp.float32),
        grid_spec=pltpu.PrefetchScalarGridSpec(
            num_scalar_prefetch=0,
            grid=(batch_p2 // tm, hidden_p // tk),
            in_specs=[
                pl.BlockSpec((tm, tk), lambda i, k: (i, k)),
                pl.BlockSpec((tk, n_pad), lambda i, k: (k, 0)),
                pl.BlockSpec((1, n_pad), lambda i, k: (0, 0)),
            ],
            out_specs=pl.BlockSpec((tm, n_pad), lambda i, k: (i, 0)),
            scratch_shapes=[pltpu.VMEM((tm, n_pad), jnp.float32)],
        ),
        compiler_params=pltpu.CompilerParams(
            dimension_semantics=("parallel", "arbitrary"),
            vmem_limit_bytes=64 * 1024 * 1024,
        ),
        cost_estimate=cost,
    )(x_t, w_t, b_p)
    return out_p[:batch, :n_task]


if __name__ == "__main__":
    batch, hidden, n_task = 8, 32, 4

    key = jax.random.PRNGKey(0)
    kx, kw, kb = jax.random.split(key, 3)

    # Deterministic example inputs / synthetic backbone parameters.
    x = jax.random.normal(kx, (batch, hidden), dtype=jnp.float32)
    w = jax.random.normal(kw, (hidden, n_task), dtype=jnp.float32) * 0.1
    b = jax.random.normal(kb, (n_task,), dtype=jnp.float32) * 0.1

    # TSModel.__init__: self.temperature = nn.Parameter(torch.ones(n_task))
    temperature = jnp.ones((n_task,), dtype=jnp.float32)

    out = ts_model_forward(x, w, b, temperature)
    out = jax.block_until_ready(out)
    ref = (x @ w + b[None, :]) / temperature[None, :]
    assert out.shape == (batch, n_task)
    assert jnp.allclose(out, ref, atol=1e-5, rtol=1e-5)

    # Also check with a learned (non-unit) temperature to exercise the fold.
    temperature2 = jnp.array([0.7, 1.3, 2.0, 0.5], dtype=jnp.float32)
    out2 = jax.block_until_ready(ts_model_forward(x, w, b, temperature2))
    ref2 = (x @ w + b[None, :]) / temperature2[None, :]
    assert jnp.allclose(out2, ref2, atol=1e-5, rtol=1e-5)

    print("KERNEL_OK")
</pallas_src>

<mosaic_0001>
module attributes {stable_mosaic.version = 11 : i64} {
  func.func @_ts_small_kernel(%arg0: memref<8x32xf32, #tpu.memory_space<vmem>>, %arg1: memref<32x128xf32, #tpu.memory_space<vmem>>, %arg2: memref<1x128xf32, #tpu.memory_space<vmem>>, %arg3: memref<8x128xf32, #tpu.memory_space<vmem>>) attributes {dimension_semantics = [], scalar_prefetch = 0 : i64, scratch_operands = 0 : i64, tpu.core_type = #tpu.core_type<tc>} {
    %c0 = arith.constant 0 : index
    %c0_0 = arith.constant 0 : index
    %0 = vector.load %arg0[%c0, %c0_0] : memref<8x32xf32, #tpu.memory_space<vmem>>, vector<8x32xf32>
    %c0_1 = arith.constant 0 : index
    %c0_2 = arith.constant 0 : index
    %1 = vector.load %arg1[%c0_1, %c0_2] : memref<32x128xf32, #tpu.memory_space<vmem>>, vector<32x128xf32>
    %cst = arith.constant dense<0.000000e+00> : vector<8x128xf32>
    %2 = tpu.matmul %0, %1, %cst {dimension_numbers = #tpu.dot_dimension_numbers<[1], [0], [0], [1], [0, 0, 1, 1], [], []>} : vector<8x32xf32>, vector<32x128xf32>, vector<8x128xf32> -> vector<8x128xf32>
    %c0_3 = arith.constant 0 : index
    %c0_4 = arith.constant 0 : index
    %3 = vector.load %arg2[%c0_3, %c0_4] : memref<1x128xf32, #tpu.memory_space<vmem>>, vector<1x128xf32>
    %4 = vector.broadcast %3 : vector<1x128xf32> to vector<8x128xf32>
    %5 = arith.addf %2, %4 : vector<8x128xf32>
    %c0_5 = arith.constant 0 : index
    %c0_6 = arith.constant 0 : index
    %6 = vector.load %arg3[%c0_5, %c0_6] : memref<8x128xf32, #tpu.memory_space<vmem>>, vector<8x128xf32>
    tpu.vector_store %arg3[%c0_5, %c0_6], %5 {strides = array<i32>} : memref<8x128xf32, #tpu.memory_space<vmem>>, vector<8x128xf32>,
    return
  }
}

</mosaic_0001>

<bundles_post_ra>
// kernel: tpu_custom_call.1
= control target key start
LH: loop header
LB: loop body
LE: loop exit
PB: predicated region body
PF: predicated region fallthrough
CT: control target
= control target key end

     0   :  { %8 = vsyncpa [#allocation3], 0  ;;  %s274_s0 = inlined_call_operand.hbm [shape: f32[8,32], index: 0, kind: input, shape index: {}]   ;;  %s275_s1 = inlined_call_operand.hbm [shape: f32[32,128], index: 1, kind: input, shape index: {}]   ;;  %s276_s2 = inlined_call_operand.vmem [shape: f32[1,128], index: 2, kind: input, shape index: {}]   ;;  %s277_s3 = inlined_call_operand.hbm [shape: f32[8,128], index: 3, kind: output, shape index: {}]  }
   0x1   :  { %9 = vsyncpa [#allocation6], 0 }
   0x2   :  { %10 = vsyncpa [#allocation4], 0  ;;  %s235_s12 = smov [#allocation2]   ;;  %s236_s14 = smov [#allocation5]  }
   0x3   :  { %s17_s13 = sshll.u32 %s235_s12, 4  ;;  %s26_s15 = sshll.u32 %s236_s14, 4  ;;  %s18_s13 = int_to_ptr.vmem [resolvable:$true] %s17_s13  ;;  %s27_s15 = int_to_ptr.vmem [resolvable:$true] %s26_s15 }
   0x4   :  { %s177_s16 = scalar_lea.vmem %s18_s13, 128  ;;  %p182_p1 = scmp.lt.s32.totalorder %s18_s13, %s18_s13 }
   0x5   :  { %p178_p0 = scmp.ne.s32.totalorder %s18_s13, %s177_s16  ;;  %p183_p2 = scmp.lt.s32.totalorder %s177_s16, %s177_s16 }
   0x7   :  { %p184_p3 = por %p183_p2, %p182_p1 }
   0x9   :  { %p185_p4 = pnand %p184_p3, %p178_p0 }
   0xb   :  { %188 = shalt.err (!%p185_p4)
}
   0xc   :  { %20 = dma.hbm_to_vmem [thread:$0]  %s274_s0, 128, %s18_s13, [#allocation3]  }
   0xd   :  { %s197_s19 = scalar_lea.vmem %s27_s15, 512  ;;  %p202_p6 = scmp.lt.s32.totalorder %s27_s15, %s27_s15 }
   0xe   :  { %p198_p5 = scmp.ne.s32.totalorder %s27_s15, %s197_s19  ;;  %p203_p7 = scmp.lt.s32.totalorder %s197_s19, %s197_s19 }
  0x10   :  { %p204_p8 = por %p203_p7, %p202_p6 }
  0x12   :  { %p205_p9 = pnand %p204_p8, %p198_p5 }
  0x14   :  { %208 = shalt.err (!%p205_p9)
}
  0x15   :  { %s237_s20 = smov 128   ;;  %s238_s21 = smov 8  }
  0x16   :  { %32 = dma.hbm_to_vmem [thread:$0]  %s275_s1, 512, %s27_s15, [#allocation6], %s237_s20, %s237_s20, %s238_s21  }
  0x17   :  { %229 = dma.done.wait [#allocation3], 128  }
  0x18   :  { %230 = vsyncadd [#allocation3], 4294967168 }
  0x19   :  { %231 = dma.done.wait [#allocation6], 512  }
  0x1a   :  { %232 = vsyncadd [#allocation6], 4294966784  ;;  %v239_v0 = vmov 0.0   ;;  %vm240_vm0 = vmmov 0   ;;  %v45_v1 = vld [vmem:[#allocation5 + $0x18] sm:$0xff]  ;;  %v44_v2 = vld [vmem:[#allocation5 + $0x10] sm:$0xff] }
  0x1b   :  { %151 = vmatprep.subr.mxu0 %v239_v0  ;;  %159 = vmatprep.mubr.msk.f32.mxu0 %vm240_vm0, %v239_v0  ;;  %v43_v3 = vld [vmem:[#allocation5 + $0x8] sm:$0xff]  ;;  %v42_v4 = vld [vmem:[#allocation5] sm:$0xff]  ;;  %v41_v5 = vld [vmem:[#allocation2] sm:$0xff]  ;;  %vm53_vm1 = vcmask 261120   ;;  %s241_s24 = smov [#allocation7]  }
  0x1c   :  { %152 = vmatpush3.msra.mxu0 %v45_v1  ;;  %v144_v6 = vld [vmem:[%s276_s2] ss:$0 sm:$0xff]  ;;  %s134_s25 = sshll.u32 %s241_s24, 4  ;;  %s135_s25 = int_to_ptr.vmem [resolvable:$true] %s134_s25 }
  0x1d   :  { %153 = vmatprep.subr.mxu0 %v239_v0  ;;  %s209_s26 = scalar_lea.vmem %s135_s25, 128  ;;  %p214_p11 = scmp.lt.s32.totalorder %s135_s25, %s135_s25 }
  0x1e   :  { %154 = vmatpush3.msra.mxu0 %v44_v2  ;;  %p210_p10 = scmp.ne.s32.totalorder %s135_s25, %s209_s26  ;;  %p215_p12 = scmp.lt.s32.totalorder %s209_s26, %s209_s26 }
  0x1f   :  { %155 = vmatprep.subr.mxu0 %v239_v0 }
  0x20   :  { %156 = vmatpush3.msra.mxu0 %v43_v3  ;;  %p216_p13 = por %p215_p12, %p214_p11 }
  0x21   :  { %157 = vmatprep.subr.mxu0 %v239_v0 }
  0x22   :  { %158 = vmatpush3.msra.mxu0 %v42_v4  ;;  %p217_p0 = pnand %p216_p13, %p210_p10 }
  0x23   :  { %160 = vmatmul.mubr.msk.f32.vlgmr.msra.gmra.mxu0 %vm53_vm1, %v41_v5 }
  0xe3   :  { %v123_v7 = vpop.f32.mrf.mxu0 }
  0xe4   :  { %v124_v8 = vadd.f32 %v144_v6, %v123_v7 }
  0xe5   :  { %v161_v9 = vpop.f32.mrf.mxu0 }
  0xe6   :  { %127 = vst [vmem:[#allocation7] sm:$0xff] %v124_v8 }
  0xe7   :  { %220 = shalt.err (!%p217_p0)
}
  0xe8   :  { %137 = dma.vmem_to_hbm [thread:$0]  %s135_s25, 128, %s277_s3, [#allocation4]  }
  0xe9   :  { %233 = dma.done.wait [#allocation4], 128  }
  0xea   :  { %234 = vsyncadd [#allocation4], 4294967168 }
  0xeb   :  { %141 = vsyncpa [#allocation3], 1 }
  0xec   :  { %142 = vsyncpa [#allocation6], 1 }
  0xed   :  { %143 = vsyncpa [#allocation4], 1 }

</bundles_post_ra>
